<compile_context>
chip_gen: v7x
topology: tpu7x:2x2x1
jax: 0.10.0
libtpu: 0.0.40
codegen_flags: <defaults>
</compile_context>

<pallas_src>
import jax
import jax.numpy as jnp
from jax.experimental import pallas as pl
from jax.experimental.pallas import tpu as pltpu

LEAKY_SLOPE = 0.01  # nn.LeakyReLU() default negative_slope


def _cdiv(a, b):
    return -(-a // b)


def _round_up(n, m):
    return _cdiv(n, m) * m


def _pick_hidden_chunk(H, target):
    """Chunk size for the hidden dim: H itself if small, otherwise the largest
    multiple of 128 <= target that divides H exactly (so the reduction over H
    never reads out-of-bounds weight columns/rows)."""
    if H <= target:
        return H
    for th in range(target - (target % 128), 127, -128):
        if H % th == 0:
            return th
    # No aligned divisor found: fall back to one chunk (correct, just uses
    # more VMEM for very large, oddly-sized H).
    return H


def _mlp_kernel(x_ref, w1_ref, b1_ref, w2_ref, b2_ref, o_ref, acc_ref):
    k = pl.program_id(1)

    @pl.when(k == 0)
    def _init():
        acc_ref[...] = jnp.zeros_like(acc_ref)

    cd = w1_ref.dtype  # MXU compute dtype (f32 or bf16), chosen by the caller
    # fc1 chunk: (TB, In) @ (In, TH) with f32 accumulation on the MXU.
    h = jnp.dot(x_ref[...].astype(cd), w1_ref[...],
                preferred_element_type=jnp.float32)
    h = h + b1_ref[...].astype(jnp.float32)          # broadcast (1, TH)
    # LeakyReLU (negative_slope = 0.01); `h >= 0` matches PyTorch at 0.
    h = jnp.where(h >= 0, h, LEAKY_SLOPE * h)
    # fc2 partial product: (TB, TH) @ (TH, Out), accumulated over H chunks.
    acc_ref[...] += jnp.dot(h.astype(w2_ref.dtype), w2_ref[...],
                            preferred_element_type=jnp.float32)

    @pl.when(k == pl.num_programs(1) - 1)
    def _finalize():
        out = acc_ref[...] + b2_ref[...].astype(jnp.float32)
        o_ref[...] = out.astype(o_ref.dtype)


def encode_mlp(x, w1, b1, w2, b2, *, block_b=512, hidden_chunk=1024):
    """Fused encodeMLP forward: LeakyReLU(x @ w1 + b1) @ w2 + b2.

    x : (B, input_size)
    w1: (input_size, hidden_size)   b1: (hidden_size,)
    w2: (hidden_size, output_size)  b2: (output_size,)
    returns (B, output_size), dtype = x.dtype.
    """
    B, In = x.shape
    In1, H = w1.shape
    H2, Out = w2.shape
    assert In1 == In and H2 == H and b1.shape == (H,) and b2.shape == (Out,)

    # Biases as (1, N) rows (metadata-only reshape, no extra HBM pass).
    b1r = b1.reshape(1, H)
    b2r = b2.reshape(1, Out)

    # --- hidden-dim chunking (collapses to one chunk for small H) ----------
    TH = _pick_hidden_chunk(H, hidden_chunk)
    n_h = _cdiv(H, TH)            # exact: TH == H or TH divides H

    # --- batch tile: >= 2 grid steps (even count) for v7x dual-TC sharding,
    #     near-even split so the last tile never balloons; no batch padding.
    num_steps = max(2, _cdiv(B, block_b))
    if num_steps % 2:
        num_steps += 1
    TB = min(block_b, max(8, _round_up(_cdiv(B, num_steps), 8)))

    # --- VMEM budgeting: shrink TB if needed, and set an explicit limit ----
    def vmem_bytes(tb):
        w_bytes = ((In * TH + TH * Out) * w1.dtype.itemsize
                   + TH * b1.dtype.itemsize + Out * b2.dtype.itemsize)
        act_bytes = tb * In * x.dtype.itemsize + tb * Out * x.dtype.itemsize
        scratch = tb * Out * 4 + tb * TH * 4   # f32 acc + (TB, TH) intermediate
        return 2 * (w_bytes + act_bytes) + scratch   # x2: double buffering

    while vmem_bytes(TB) > (48 << 20) and TB > 8:
        TB = max(8, _round_up(TB // 2, 8))
    n_b = _cdiv(B, TB)

    vmem_limit = int(max(16 << 20,
                         min(56 << 20, vmem_bytes(TB) * 3 // 2 + (2 << 20))))

    # Scheduler hint from true (unpadded) dims.
    cost = pl.CostEstimate(
        flops=2 * B * (In * H + H * Out),
        transcendentals=0,
        bytes_accessed=int(x.nbytes + w1.nbytes + b1.nbytes + w2.nbytes
                           + b2.nbytes + B * Out * x.dtype.itemsize),
    )

    return pl.pallas_call(
        _mlp_kernel,
        out_shape=jax.ShapeDtypeStruct((B, Out), x.dtype),
        grid=(n_b, n_h),
        in_specs=[
            # Activation tile streams along the batch axis, resident over k.
            pl.BlockSpec((TB, In), lambda i, k: (i, 0)),
            # Weight / bias chunks: constant over the batch axis -> resident
            # in VMEM (and, for n_h == 1, constant over the whole grid).
            pl.BlockSpec((In, TH), lambda i, k: (0, k)),
            pl.BlockSpec((1, TH), lambda i, k: (0, k)),
            pl.BlockSpec((TH, Out), lambda i, k: (k, 0)),
            pl.BlockSpec((1, Out), lambda i, k: (0, 0)),
        ],
        out_specs=pl.BlockSpec((TB, Out), lambda i, k: (i, 0)),
        scratch_shapes=[pltpu.VMEM((TB, Out), jnp.float32)],
        compiler_params=pltpu.CompilerParams(
            dimension_semantics=("parallel", "arbitrary"),
            vmem_limit_bytes=vmem_limit),
        cost_estimate=cost,
    )(x, w1, b1r, w2, b2r)


def _reference(x, w1, b1, w2, b2):
    """Pure-JAX reference applying the same cast points as the kernel."""
    cd = w1.dtype
    h = jnp.dot(x.astype(cd), w1, preferred_element_type=jnp.float32) + b1
    h = jnp.where(h >= 0, h, LEAKY_SLOPE * h)
    return jnp.dot(h.astype(w2.dtype), w2,
                   preferred_element_type=jnp.float32) + b2


if __name__ == "__main__":
    key = jax.random.PRNGKey(0)
    k_x, k_w1, k_b1, k_w2, k_b2 = jax.random.split(key, 5)

    # Small shapes consistent with the module's forward.
    batch, input_size, hidden_size, output_size = 64, 16, 32, 16

    x = jax.random.normal(k_x, (batch, input_size), dtype=jnp.float32)
    # Deterministic synthetic parameters (PyTorch-style uniform init bounds).
    bound1 = 1.0 / (input_size ** 0.5)
    bound2 = 1.0 / (hidden_size ** 0.5)
    w1 = jax.random.uniform(k_w1, (input_size, hidden_size),
                            minval=-bound1, maxval=bound1, dtype=jnp.float32)
    b1 = jax.random.uniform(k_b1, (hidden_size,),
                            minval=-bound1, maxval=bound1, dtype=jnp.float32)
    w2 = jax.random.uniform(k_w2, (hidden_size, output_size),
                            minval=-bound2, maxval=bound2, dtype=jnp.float32)
    b2 = jax.random.uniform(k_b2, (output_size,),
                            minval=-bound2, maxval=bound2, dtype=jnp.float32)

    # f32 weights path.  Tolerance covers MXU-pass precision differences
    # between the kernel and XLA's default f32 matmul lowering.
    out = jax.block_until_ready(encode_mlp(x, w1, b1, w2, b2))
    ref = _reference(x, w1, b1, w2, b2)
    assert out.shape == (batch, output_size)
    assert out.dtype == x.dtype
    assert jnp.allclose(out, ref, atol=2e-2, rtol=2e-2)

    # bf16 weights path (pre-cast once, outside the per-call path) -> runs
    # the MXU at full bf16 rate while keeping f32 accumulation.
    w1_bf = w1.astype(jnp.bfloat16)
    w2_bf = w2.astype(jnp.bfloat16)
    out_bf = jax.block_until_ready(encode_mlp(x, w1_bf, b1, w2_bf, b2))
    ref_bf = _reference(x, w1_bf, b1, w2_bf, b2)
    assert out_bf.shape == (batch, output_size)
    assert jnp.allclose(out_bf, ref_bf, atol=5e-2, rtol=5e-2)

    print("KERNEL_OK")
</pallas_src>

<mosaic_0001>
module attributes {stable_mosaic.version = 11 : i64} {
  func.func @_mlp_kernel(%arg0: i32, %arg1: i32, %arg2: memref<32x16xf32, #tpu.memory_space<vmem>>, %arg3: memref<16x32xf32, #tpu.memory_space<vmem>>, %arg4: memref<1x32xf32, #tpu.memory_space<vmem>>, %arg5: memref<32x16xf32, #tpu.memory_space<vmem>>, %arg6: memref<1x16xf32, #tpu.memory_space<vmem>>, %arg7: memref<32x16xf32, #tpu.memory_space<vmem>>, %arg8: memref<32x16xf32, #tpu.memory_space<vmem>>) attributes {dimension_semantics = [#tpu.dimension_semantics<parallel>, #tpu.dimension_semantics<arbitrary>], iteration_bounds = array<i64: 2, 1>, scalar_prefetch = 0 : i64, scratch_operands = 1 : i64, tpu.core_type = #tpu.core_type<tc>, window_params = [{transform_indices = @transform_0, window_bounds = array<i64: 32, 16>}, {transform_indices = @transform_1, window_bounds = array<i64: 16, 32>}, {transform_indices = @transform_2, window_bounds = array<i64: 1, 32>}, {transform_indices = @transform_3, window_bounds = array<i64: 32, 16>}, {pipeline_mode = #tpu.pipeline_mode<synchronous>, transform_indices = @transform_4, window_bounds = array<i64: 1, 16>}, {transform_indices = @transform_5, window_bounds = array<i64: 32, 16>}]} {
    %c0_i32 = arith.constant 0 : i32
    %0 = arith.cmpi eq, %arg1, %c0_i32 : i32
    %1 = arith.extui %0 : i1 to i32
    %c0_i32_0 = arith.constant 0 : i32
    %2 = arith.cmpi ne, %1, %c0_i32_0 : i32
    scf.if %2 {
      %cst_17 = arith.constant 0.000000e+00 : f32
      %22 = vector.broadcast %cst_17 : f32 to vector<32x16xf32>
      %c0_18 = arith.constant 0 : index
      %c0_19 = arith.constant 0 : index
      %23 = vector.load %arg8[%c0_18, %c0_19] : memref<32x16xf32, #tpu.memory_space<vmem>>, vector<32x16xf32>
      tpu.vector_store %arg8[%c0_18, %c0_19], %22 {strides = array<i32>} : memref<32x16xf32, #tpu.memory_space<vmem>>, vector<32x16xf32>,
    } else {
    }
    %c0 = arith.constant 0 : index
    %c0_1 = arith.constant 0 : index
    %3 = vector.load %arg2[%c0, %c0_1] : memref<32x16xf32, #tpu.memory_space<vmem>>, vector<32x16xf32>
    %c0_2 = arith.constant 0 : index
    %c0_3 = arith.constant 0 : index
    %4 = vector.load %arg3[%c0_2, %c0_3] : memref<16x32xf32, #tpu.memory_space<vmem>>, vector<16x32xf32>
    %cst = arith.constant dense<0.000000e+00> : vector<32x32xf32>
    %5 = tpu.matmul %3, %4, %cst {dimension_numbers = #tpu.dot_dimension_numbers<[1], [0], [0], [1], [0, 0, 1, 1], [], []>} : vector<32x16xf32>, vector<16x32xf32>, vector<32x32xf32> -> vector<32x32xf32>
    %c0_4 = arith.constant 0 : index
    %c0_5 = arith.constant 0 : index
    %6 = vector.load %arg4[%c0_4, %c0_5] : memref<1x32xf32, #tpu.memory_space<vmem>>, vector<1x32xf32>
    %7 = vector.broadcast %6 : vector<1x32xf32> to vector<32x32xf32>
    %8 = arith.addf %5, %7 : vector<32x32xf32>
    %cst_6 = arith.constant 0.000000e+00 : f32
    %9 = vector.broadcast %cst_6 : f32 to vector<32x32xf32>
    %10 = arith.cmpf oge, %8, %9 : vector<32x32xf32>
    %cst_7 = arith.constant 0.00999999977 : f32
    %11 = vector.broadcast %cst_7 : f32 to vector<32x32xf32>
    %12 = arith.mulf %11, %8 : vector<32x32xf32>
    %13 = arith.select %10, %8, %12 : vector<32x32xi1>, vector<32x32xf32>
    %c0_8 = arith.constant 0 : index
    %c0_9 = arith.constant 0 : index
    %14 = vector.load %arg8[%c0_8, %c0_9] : memref<32x16xf32, #tpu.memory_space<vmem>>, vector<32x16xf32>
    %c0_10 = arith.constant 0 : index
    %c0_11 = arith.constant 0 : index
    %15 = vector.load %arg5[%c0_10, %c0_11] : memref<32x16xf32, #tpu.memory_space<vmem>>, vector<32x16xf32>
    %cst_12 = arith.constant dense<0.000000e+00> : vector<32x16xf32>
    %16 = tpu.matmul %13, %15, %cst_12 {dimension_numbers = #tpu.dot_dimension_numbers<[1], [0], [0], [1], [0, 0, 1, 1], [], []>} : vector<32x32xf32>, vector<32x16xf32>, vector<32x16xf32> -> vector<32x16xf32>
    %17 = arith.addf %14, %16 : vector<32x16xf32>
    %c0_13 = arith.constant 0 : index
    %c0_14 = arith.constant 0 : index
    %18 = vector.load %arg8[%c0_13, %c0_14] : memref<32x16xf32, #tpu.memory_space<vmem>>, vector<32x16xf32>
    tpu.vector_store %arg8[%c0_13, %c0_14], %17 {strides = array<i32>} : memref<32x16xf32, #tpu.memory_space<vmem>>, vector<32x16xf32>,
    %c0_i32_15 = arith.constant 0 : i32
    %19 = arith.cmpi eq, %arg1, %c0_i32_15 : i32
    %20 = arith.extui %19 : i1 to i32
    %c0_i32_16 = arith.constant 0 : i32
    %21 = arith.cmpi ne, %20, %c0_i32_16 : i32
    scf.if %21 {
      %c0_17 = arith.constant 0 : index
      %c0_18 = arith.constant 0 : index
      %22 = vector.load %arg8[%c0_17, %c0_18] : memref<32x16xf32, #tpu.memory_space<vmem>>, vector<32x16xf32>
      %c0_19 = arith.constant 0 : index
      %c0_20 = arith.constant 0 : index
      %23 = vector.load %arg6[%c0_19, %c0_20] : memref<1x16xf32, #tpu.memory_space<vmem>>, vector<1x16xf32>
      %24 = vector.broadcast %23 : vector<1x16xf32> to vector<32x16xf32>
      %25 = arith.addf %22, %24 : vector<32x16xf32>
      %c0_21 = arith.constant 0 : index
      %c0_22 = arith.constant 0 : index
      %26 = vector.load %arg7[%c0_21, %c0_22] : memref<32x16xf32, #tpu.memory_space<vmem>>, vector<32x16xf32>
      tpu.vector_store %arg7[%c0_21, %c0_22], %25 {strides = array<i32>} : memref<32x16xf32, #tpu.memory_space<vmem>>, vector<32x16xf32>,
    } else {
    }
    return
  }
  func.func @transform_0(%arg0: i32, %arg1: i32) -> (i32, i32) {
    %c0_i32 = arith.constant 0 : i32
    %c0_i32_0 = arith.constant 0 : i32
    return %arg0, %c0_i32 : i32, i32
  }
  func.func @transform_1(%arg0: i32, %arg1: i32) -> (i32, i32) {
    %c0_i32 = arith.constant 0 : i32
    %c0_i32_0 = arith.constant 0 : i32
    return %c0_i32, %arg1 : i32, i32
  }
  func.func @transform_2(%arg0: i32, %arg1: i32) -> (i32, i32) {
    %c0_i32 = arith.constant 0 : i32
    %c0_i32_0 = arith.constant 0 : i32
    return %c0_i32, %arg1 : i32, i32
  }
  func.func @transform_3(%arg0: i32, %arg1: i32) -> (i32, i32) {
    %c0_i32 = arith.constant 0 : i32
    %c0_i32_0 = arith.constant 0 : i32
    return %arg1, %c0_i32 : i32, i32
  }
  func.func @transform_4(%arg0: i32, %arg1: i32) -> (i32, i32) {
    %c0_i32 = arith.constant 0 : i32
    %c0_i32_0 = arith.constant 0 : i32
    %c0_i32_1 = arith.constant 0 : i32
    return %c0_i32, %c0_i32_0 : i32, i32
  }
  func.func @transform_5(%arg0: i32, %arg1: i32) -> (i32, i32) {
    %c0_i32 = arith.constant 0 : i32
    %c0_i32_0 = arith.constant 0 : i32
    return %arg0, %c0_i32 : i32, i32
  }
}

</mosaic_0001>

<bundles_post_ra>
// kernel: tpu_custom_call.1
= control target key start
LH: loop header
LB: loop body
LE: loop exit
PB: predicated region body
PF: predicated region fallthrough
CT: control target
= control target key end

     0   :  { %s822_s18 = smov 0   ;;  %s824_s19 = smov 0   ;;  %s902_s0 = inlined_call_operand.vmem [shape: f32[64,16], index: 0, kind: input, shape index: {}]   ;;  %s903_s1 = inlined_call_operand.vmem [shape: f32[16,32], index: 1, kind: input, shape index: {}]   ;;  %s904_s2 = inlined_call_operand.vmem [shape: f32[1,32], index: 2, kind: input, shape index: {}]   ;;  %s905_s3 = inlined_call_operand.vmem [shape: f32[32,16], index: 3, kind: input, shape index: {}]   ;;  %s906_s4 = inlined_call_operand.vmem [shape: f32[1,16], index: 4, kind: input, shape index: {}]   ;;  %s907_s5 = inlined_call_operand.vmem [shape: f32[64,16], index: 5, kind: output, shape index: {}]  }
   0x1   :  { %s826_s20 = smov 0  }
   0x2 LB: > { %s27_s21 = sadd.s32 1, %s785_s19  ;;  %p675_p0 = scmp.ge.s32.totalorder %s789_s20, 1  ;;  %s789_s20 = sphi %s826_s20, %s15_s20   ;;  %s785_s19 = sphi %s824_s19, %s909_s19   ;;  %s781_s18 = sphi %s822_s18, %s908_s18  }
   0x3   : > { %p29_p1 = scmp.ge.s32.totalorder %s27_s21, 2  ;;  %p228_p2 = scmp.lt.s32.totalorder %s789_s20, 3 }
   0x5   : > { %s911_s21 = smov (%p29_p1, %s27_s21), 0  ;;  %p229_p3 = pnand %p675_p0, %p228_p2 }
   0x6   : > { %v306_v0 = vld [vmem:[%s903_s1] sm:$0xff] (!%p229_p3)  ;;  %v307_v1 = vld [vmem:[%s903_s1 + $0x8] sm:$0xff] (!%p229_p3)  ;;  %s676_s26 = sshll.u32 (!%p229_p3), %s781_s18, 2  ;;  %vm297_vm0 = vcmask (!%p229_p3), 130048   ;;  %v431_v10 = vld [vmem:[%s905_s3 + $0x10] sm:$0xff] (!%p229_p3)  ;;  %v791_v13 = vmov (!%p229_p3), 0.0  }
   0x7   : > { %232 = sbr.rel (%p229_p3) target bundleno = 468 (0x1d4), region = 40  ;;  %v730_v2 = vpack.c.bf16 (!%p229_p3), %v307_v1, %v306_v0  ;;  %p269_p4 = scmp.lt.s32.totalorder (!%p229_p3), %s676_s26, 7  ;;  %v429_v7 = vld [vmem:[%s905_s3] sm:$0xff] (!%p229_p3)  ;;  %v430_v8 = vld [vmem:[%s905_s3 + $0x8] sm:$0xff] (!%p229_p3)  ;;  %v432_v11 = vld [vmem:[%s905_s3 + $0x18] sm:$0xff] (!%p229_p3)  ;;  %299 = vst.msk [vmem:[#allocation2 + $0x8] sm:$0xff] (!%p229_p3), %vm297_vm0, %v791_v13 }
   0x8   : > { %v734_v9 = vpack.c.bf16 (!%p229_p3), %v430_v8, %v429_v7  ;;  %v738_v12 = vpack.c.bf16 (!%p229_p3), %v432_v11, %v431_v10  ;;  %298 = vst.msk [vmem:[#allocation2] sm:$0xff] (!%p229_p3), %vm297_vm0, %v791_v13  ;;  %300 = vst.msk [vmem:[#allocation2 + $0x10] sm:$0xff] (!%p229_p3), %vm297_vm0, %v791_v13  ;;  %v680_v14 = vld [vmem:[%s904_s2] ss:$0 sm:$0xff] (!%p229_p3)  ;;  %vm433_vm3 = vcmask (!%p229_p3), 261120  }
   0x9   : > { %731 = vmatprep.subr.bf16.mxu0 (!%p229_p3), %v730_v2  ;;  %301 = vst.msk [vmem:[#allocation2 + $0x18] sm:$0xff] (!%p229_p3), %vm297_vm0, %v791_v13  ;;  %v689_v43 = vld [vmem:[%s906_s4] ss:$0 sm:$0xff] (!%p229_p3) }
   0xa   : > { %733 = vmatpush3.bf16.msra.mxu0 (!%p229_p3), %v730_v2  ;;  %735 = vmatprep.subr.bf16.mxu1 (!%p229_p3), %v734_v9 }
   0xb   : > { %737 = vmatpush3.bf16.msra.mxu1 (!%p229_p3), %v734_v9 }
   0xc   : > { %739 = vmatprep.subr.bf16.mxu1 (!%p229_p3), %v738_v12 }
   0xe   : > { %s913_s26 = smov (!%p269_p4, %s676_s26), 7  ;;  %v426_v31 = vld [vmem:[#allocation2 + $0x8] sm:$0xff] }
   0xf   : > { %s677_s27 = sshll.u32 %s913_s26, 3  ;;  %741 = vmatpush3.bf16.msra.mxu1 %v738_v12  ;;  %v425_v32 = vld [vmem:[#allocation2] sm:$0xff]  ;;  %v427_v38 = vld [vmem:[#allocation2 + $0x10] sm:$0xff] }
  0x10   : > { %s272_s30 = scalar_lea.vmem %s902_s0, %s677_s27  ;;  %v428_v37 = vld [vmem:[#allocation2 + $0x18] sm:$0xff]  ;;  %s291_s23 = scalar_lea.vmem %s907_s5, %s677_s27 }
  0x11   : > { %v302_v3 = vld [vmem:[%s272_s30] sm:$0xff]  ;;  %v303_v4 = vld [vmem:[%s272_s30 + $0x8] sm:$0xff]  ;;  %v304_v5 = vld [vmem:[%s272_s30 + $0x10] sm:$0xff] }
  0x12   : > { %710 = vmatprep.mubr.msk.f32.mxu0 %vm297_vm0, %v302_v3  ;;  %v305_v6 = vld [vmem:[%s272_s30 + $0x18] sm:$0xff] }
  0x13   : > { %711 = vmatmul.mubr.msk.f32.vlgmr.msra.gmra.mrb[0].mxu0 %vm297_vm0, %v303_v4 }
  0x14   : > { %713 = vmatprep.mubr.msk.f32.mxu0 %vm297_vm0, %v304_v5 }
  0x17   : > { %714 = vmatmul.mubr.msk.f32.gmra.mrb[2].mxu0 %vm297_vm0, %v305_v6 }
  0xe6   : > { %v712_v15 = vpop.f32.mrb[0].mxu0 }
  0xe7   : > { %v400_v16 = vadd.f32 %v712_v15, %v680_v14  ;;  %v394_v17 = vpop.f32.mrb[1].mxu0 }
  0xe8   : > { %v395_v18 = vadd.f32 %v680_v14, %v394_v17 }
  0xe9   : > { %v418_v19 = vmul.f32 0.01, %v400_v16  ;;  %vm414_vm1 = vcmp.ge.f32.partialorder %v400_v16, 0.0 }
  0xea   : > { %v715_v20 = vpop.f32.mrb[2].mxu0  ;;  %vm413_vm2 = vcmp.ge.f32.partialorder %v395_v18, 0.0  ;;  %v417_v21 = vmul.f32 0.01, %v395_v18 }
  0xeb   : > { %v410_v22 = vadd.f32 %v715_v20, %v680_v14  ;;  %v404_v23 = vpop.f32.mrb[3].mxu0  ;;  %v422_v27 = vsel %vm414_vm1, %v400_v16, %v418_v19 }
  0xec   : > { %v405_v24 = vadd.f32 %v680_v14, %v404_v23  ;;  %v421_v25 = vsel %vm413_vm2, %v395_v18, %v417_v21 }
  0xed   : > { %v420_v26 = vmul.f32 0.01, %v410_v22  ;;  %724 = vmatprep.mubr.msk.f32.mxu1 %vm433_vm3, %v421_v25  ;;  %vm416_vm4 = vcmp.ge.f32.partialorder %v410_v22, 0.0 }
  0xee   : > { %vm415_vm5 = vcmp.ge.f32.partialorder %v405_v24, 0.0  ;;  %v419_v28 = vmul.f32 0.01, %v405_v24  ;;  %725 = vmatmul.mubr.msk.f32.vlgmr.msra.gmra.mrb[0].mxu1 %vm433_vm3, %v422_v27 }
  0xef   : > { %v424_v30 = vsel %vm416_vm4, %v410_v22, %v420_v26 }
  0xf0   : > { %v423_v29 = vsel %vm415_vm5, %v405_v24, %v419_v28 }
  0xf1   : > { %727 = vmatprep.mubr.msk.f32.mxu1 %vm433_vm3, %v423_v29 }
  0xf2   : > { %728 = vmatmul.mubr.msk.f32.gmra.mrb[2].mxu1 %vm433_vm3, %v424_v30 }
 0x1c1   : > { %v726_v33 = vpop.f32.mrb[0].mxu1 }
 0x1c2   : > { %v532_v34 = vadd.f32 %v726_v33, %v426_v31  ;;  %v512_v35 = vpop.f32.mrb[1].mxu1 }
 0x1c3   : > { %v531_v36 = vadd.f32 %v512_v35, %v425_v32 }
 0x1c4   : > { %536 = vst.msk [vmem:[#allocation2 + $0x8] sm:$0xff] %vm297_vm0, %v532_v34 }
 0x1c5   : > { %535 = vst.msk [vmem:[#allocation2] sm:$0xff] %vm297_vm0, %v531_v36  ;;  %v729_v39 = vpop.f32.mrb[2].mxu1 }
 0x1c6   : > { %v534_v40 = vadd.f32 %v729_v39, %v428_v37  ;;  %v522_v41 = vpop.f32.mrb[3].mxu1 }
 0x1c7   : > { %v533_v42 = vadd.f32 %v522_v41, %v427_v38 }
 0x1c8   : > { %538 = vst.msk [vmem:[#allocation2 + $0x18] sm:$0xff] %vm297_vm0, %v534_v40 }
 0x1c9   : > { %537 = vst.msk [vmem:[#allocation2 + $0x10] sm:$0xff] %vm297_vm0, %v533_v42 }
 0x1cb   : > { %v543_v44 = vld [vmem:[#allocation2 + $0x8] sm:$0xff] }
 0x1cc   : > { %v542_v45 = vld [vmem:[#allocation2] sm:$0xff]  ;;  %v554_v47 = vadd.f32 %v689_v43, %v543_v44 }
 0x1cd   : > { %v553_v46 = vadd.f32 %v689_v43, %v542_v45 }
 0x1ce   : > { %558 = vst.msk [vmem:[%s291_s23 + $0x8] sm:$0xff] %vm297_vm0, %v554_v47 }
 0x1cf   : > { %557 = vst.msk [vmem:[%s291_s23] sm:$0xff] %vm297_vm0, %v553_v46  ;;  %v545_v48 = vld [vmem:[#allocation2 + $0x18] sm:$0xff] }
 0x1d0   : > { %v544_v49 = vld [vmem:[#allocation2 + $0x10] sm:$0xff]  ;;  %v556_v51 = vadd.f32 %v689_v43, %v545_v48 }
 0x1d1   : > { %v555_v50 = vadd.f32 %v689_v43, %v544_v49 }
 0x1d2   : > { %560 = vst.msk [vmem:[%s291_s23 + $0x18] sm:$0xff] %vm297_vm0, %v556_v51 }
 0x1d3   : > { %559 = vst.msk [vmem:[%s291_s23 + $0x10] sm:$0xff] %vm297_vm0, %v555_v50 }
 0x1d4 PF: > { %s15_s20 = sadd.s32 1, %s789_s20   ;;  %s908_s18 = smov %s785_s19 }
 0x1d5   : > { %p12_p5 = scmp.ge.s32.totalorder %s15_s20, 4   ;;  %s909_s19 = smov %s911_s21 }
 0x1d7   :  { %14 = sbr.rel (!%p12_p5) target bundleno = 2 (0x2), region = 87 }

</bundles_post_ra>
